<compile_context>
chip_gen: v7x
topology: tpu7x:2x2x1
jax: 0.10.0
libtpu: 0.0.40
codegen_flags: <defaults>
</compile_context>

<pallas_src>
import jax
import jax.numpy as jnp
from jax.experimental import pallas as pl
from jax.experimental.pallas import tpu as pltpu


def _z0_kernel(x_ref, wt_ref, o_ref):
    # x_ref  : (TB, dx)       float32  batch tile of x0
    # wt_ref : (dx, d_pred)   float32  pre-transposed Linear weight (W.T)
    # o_ref  : (TB, dz)       float32  z0 tile = [x0, x0 @ W.T]
    x = x_ref[...]
    pred = jnp.dot(x, wt_ref[...], preferred_element_type=jnp.float32)
    # Whole-tile store of concat([x, pred], dim=1).  dz < 128 lanes => the
    # rows are masked stores; acceptable because HBM DMA binds, not vst.
    o_ref[...] = jnp.concatenate([x, pred.astype(x.dtype)], axis=1).astype(o_ref.dtype)


def z0_model_forward(x0: jax.Array, w: jax.Array, *, tb: int = 8192) -> jax.Array:
    """Forward pass of Z0Model.

    Args:
      x0: (B, dx) initial observations.
      w : (dz-dx, dx) nn.Linear weight in PyTorch layout (out_features, in_features).
      tb: batch tile size (rows per grid step), rounded to a multiple of 8.

    Returns:
      z0: (B, dz) = concat([x0, x0 @ w.T], axis=1)
    """
    B, dx = x0.shape
    d_pred, dx_w = w.shape
    assert dx == dx_w, "weight in_features must match x0 feature dim"
    dz = dx + d_pred

    # Pre-transpose the (tiny, ~KiB-scale) weight once on the host side so the
    # kernel body is a plain row-major contraction every grid step.
    w_t = jnp.transpose(w)  # (dx, d_pred)

    # Batch tile: multiple of 8 (f32 sublane count).  If B is small, shrink the
    # tile to the 8-rounded batch so a single (possibly partial) block covers it.
    tb = min(tb, ((B + 7) // 8) * 8)
    grid = (pl.cdiv(B, tb),)

    cost = pl.CostEstimate(
        flops=2 * B * dx * d_pred,
        transcendentals=0,
        bytes_accessed=4 * (B * dx + dx * d_pred + B * dz),
    )

    return pl.pallas_call(
        _z0_kernel,
        out_shape=jax.ShapeDtypeStruct((B, dz), x0.dtype),
        grid_spec=pltpu.PrefetchScalarGridSpec(
            num_scalar_prefetch=0,
            grid=grid,
            in_specs=[
                # Batch-tiled activations.
                pl.BlockSpec((tb, dx), lambda i: (i, 0)),
                # Weight: constant block index -> DMA'd once, VMEM-resident.
                pl.BlockSpec((dx, d_pred), lambda i: (0, 0)),
            ],
            out_specs=pl.BlockSpec((tb, dz), lambda i: (i, 0)),
        ),
        compiler_params=pltpu.CompilerParams(
            # Independent batch tiles: allow sharding across TensorCores (v7x).
            dimension_semantics=("parallel",),
        ),
        cost_estimate=cost,
    )(x0, w_t)


if __name__ == "__main__":
    # Small shapes consistent with the module: x0 of dim dx, z0 of dim dz.
    B, dx, dz = 8, 16, 48

    key = jax.random.PRNGKey(0)
    kx, kw = jax.random.split(key)

    x0 = jax.random.normal(kx, (B, dx), dtype=jnp.float32)
    # Deterministic weight mimicking nn.Linear init (uniform in +-1/sqrt(dx)),
    # in PyTorch (out_features, in_features) layout.
    bound = 1.0 / jnp.sqrt(jnp.float32(dx))
    w = jax.random.uniform(
        kw, (dz - dx, dx), dtype=jnp.float32, minval=-bound, maxval=bound
    )

    z0 = z0_model_forward(x0, w)
    z0 = jax.block_until_ready(z0)

    # Reference check in plain JAX.
    z0_ref = jnp.concatenate([x0, x0 @ w.T], axis=1)
    assert z0.shape == (B, dz)
    assert jnp.allclose(z0, z0_ref, atol=1e-5, rtol=1e-5)

    print("KERNEL_OK")
</pallas_src>

<mosaic_0001>
module attributes {stable_mosaic.version = 11 : i64} {
  func.func @_z0_kernel(%arg0: i32, %arg1: memref<8x16xf32, #tpu.memory_space<vmem>>, %arg2: memref<16x32xf32, #tpu.memory_space<vmem>>, %arg3: memref<8x48xf32, #tpu.memory_space<vmem>>) attributes {dimension_semantics = [#tpu.dimension_semantics<parallel>], iteration_bounds = array<i64: 1>, scalar_prefetch = 0 : i64, scratch_operands = 0 : i64, tpu.core_type = #tpu.core_type<tc>, window_params = [{transform_indices = @transform_0, window_bounds = array<i64: 8, 16>}, {pipeline_mode = #tpu.pipeline_mode<synchronous>, transform_indices = @transform_1, window_bounds = array<i64: 16, 32>}, {transform_indices = @transform_2, window_bounds = array<i64: 8, 48>}]} {
    %c0 = arith.constant 0 : index
    %c0_0 = arith.constant 0 : index
    %0 = vector.load %arg1[%c0, %c0_0] : memref<8x16xf32, #tpu.memory_space<vmem>>, vector<8x16xf32>
    %c0_1 = arith.constant 0 : index
    %c0_2 = arith.constant 0 : index
    %1 = vector.load %arg2[%c0_1, %c0_2] : memref<16x32xf32, #tpu.memory_space<vmem>>, vector<16x32xf32>
    %cst = arith.constant dense<0.000000e+00> : vector<8x32xf32>
    %2 = tpu.matmul %0, %1, %cst {dimension_numbers = #tpu.dot_dimension_numbers<[1], [0], [0], [1], [0, 0, 1, 1], [], []>} : vector<8x16xf32>, vector<16x32xf32>, vector<8x32xf32> -> vector<8x32xf32>
    %3 = tpu.concatenate %0, %2 in 1 : vector<8x16xf32>, vector<8x32xf32> -> vector<8x48xf32>
    %c0_3 = arith.constant 0 : index
    %c0_4 = arith.constant 0 : index
    %4 = vector.load %arg3[%c0_3, %c0_4] : memref<8x48xf32, #tpu.memory_space<vmem>>, vector<8x48xf32>
    tpu.vector_store %arg3[%c0_3, %c0_4], %3 {strides = array<i32>} : memref<8x48xf32, #tpu.memory_space<vmem>>, vector<8x48xf32>,
    return
  }
  func.func @transform_0(%arg0: i32) -> (i32, i32) {
    %c0_i32 = arith.constant 0 : i32
    %c0_i32_0 = arith.constant 0 : i32
    return %arg0, %c0_i32 : i32, i32
  }
  func.func @transform_1(%arg0: i32) -> (i32, i32) {
    %c0_i32 = arith.constant 0 : i32
    %c0_i32_0 = arith.constant 0 : i32
    %c0_i32_1 = arith.constant 0 : i32
    return %c0_i32, %c0_i32_0 : i32, i32
  }
  func.func @transform_2(%arg0: i32) -> (i32, i32) {
    %c0_i32 = arith.constant 0 : i32
    %c0_i32_0 = arith.constant 0 : i32
    return %arg0, %c0_i32 : i32, i32
  }
}

</mosaic_0001>

<bundles_post_ra>
// kernel: tpu_custom_call.1
= control target key start
LH: loop header
LB: loop body
LE: loop exit
PB: predicated region body
PF: predicated region fallthrough
CT: control target
= control target key end

     0   :  { %7 = vsyncpa [#allocation3], 0  ;;  %s300_s0 = inlined_call_operand.hbm [shape: f32[8,16], index: 0, kind: input, shape index: {}]   ;;  %s301_s1 = inlined_call_operand.hbm [shape: f32[16,32], index: 1, kind: input, shape index: {}]   ;;  %s302_s2 = inlined_call_operand.hbm [shape: f32[8,48], index: 2, kind: output, shape index: {}]  }
   0x1   :  { %8 = vsyncpa [#allocation6], 0 }
   0x2   :  { %9 = vsyncpa [#allocation4], 0  ;;  %s233_s9 = smov [#allocation2]   ;;  %s234_s11 = smov [#allocation5]  }
   0x3   :  { %s16_s10 = sshll.u32 %s233_s9, 4  ;;  %s25_s12 = sshll.u32 %s234_s11, 4  ;;  %s17_s10 = int_to_ptr.vmem [resolvable:$true] %s16_s10  ;;  %s257_s12 = int_to_ptr.vmem [resolvable:$true] %s25_s12 }
   0x4   :  { %s161_s15 = scalar_lea.hbm %s300_s0, 128 }
   0x5   :  { %p162_p0 = scmp.ne.s32.totalorder %s300_s0, %s161_s15  ;;  %p165_p1 = scmp.lt.u32.totalorder %s161_s15, %s300_s0 }
   0x7   :  { %p167_p2 = pnand %p165_p1, %p162_p0 }
   0x9   :  { %170 = shalt.err (!%p167_p2)
}
   0xa   :  { %s171_s20 = scalar_lea.vmem %s17_s10, 128  ;;  %p176_p4 = scmp.lt.s32.totalorder %s17_s10, %s17_s10 }
   0xb   :  { %p172_p3 = scmp.ne.s32.totalorder %s17_s10, %s171_s20  ;;  %p177_p5 = scmp.lt.s32.totalorder %s171_s20, %s171_s20 }
   0xd   :  { %p178_p6 = por %p177_p5, %p176_p4 }
   0xf   :  { %p179_p7 = pnand %p178_p6, %p172_p3 }
  0x11   :  { %182 = shalt.err (!%p179_p7)
}
  0x12   :  { %19 = dma.hbm_to_vmem [thread:$0]  %s300_s0, 128, %s17_s10, [#allocation3]  }
  0x13   :  { %s183_s25 = scalar_lea.hbm %s301_s1, 256 }
  0x14   :  { %p184_p8 = scmp.ne.s32.totalorder %s301_s1, %s183_s25  ;;  %p187_p9 = scmp.lt.u32.totalorder %s183_s25, %s301_s1 }
  0x16   :  { %p189_p10 = pnand %p187_p9, %p184_p8 }
  0x18   :  { %192 = shalt.err (!%p189_p10)
}
  0x19   :  { %s193_s30 = scalar_lea.vmem %s257_s12, 256  ;;  %p198_p12 = scmp.lt.s32.totalorder %s257_s12, %s257_s12 }
  0x1a   :  { %p194_p11 = scmp.ne.s32.totalorder %s257_s12, %s193_s30  ;;  %p199_p13 = scmp.lt.s32.totalorder %s193_s30, %s193_s30 }
  0x1c   :  { %p200_p0 = por %p199_p13, %p198_p12 }
  0x1e   :  { %p201_p1 = pnand %p200_p0, %p194_p11 }
  0x20   :  { %204 = shalt.err (!%p201_p1)
}
  0x21   :  { %s235_s0 = smov 128   ;;  %s236_s3 = smov 8  }
  0x22   :  { %31 = dma.hbm_to_vmem [thread:$0]  %s301_s1, 256, %s257_s12, [#allocation6], %s235_s0, %s235_s0, %s236_s3  }
  0x23   :  { %227 = dma.done.wait [#allocation3], 128  }
  0x24   :  { %228 = vsyncadd [#allocation3], 4294967168 }
  0x25   :  { %229 = dma.done.wait [#allocation6], 256  }
  0x26   :  { %230 = vsyncadd [#allocation6], 4294967040  ;;  %v237_v0 = vmov 0.0|0.0   ;;  %vm238_vm0 = vmmov 0   ;;  %v239_v1 = vmov 0.0   ;;  %v39_v2 = vld [vmem:[#allocation5] sm:$0xff] }
  0x27   :  { %149 = vmatprep.subr.bf16.mxu0 %v237_v0  ;;  %146 = vmatprep.mubr.msk.f32.mxu0 %vm238_vm0, %v239_v1  ;;  %v40_v3 = vld [vmem:[#allocation5 + $0x8] sm:$0xff]  ;;  %v38_v5 = vld [vmem:[#allocation2] sm:$0xff]  ;;  %vm41_vm1 = vcmask 130048   ;;  %s240_s6 = smov 16   ;;  %s241_s1 = smov [#allocation7]   ;;  %vm120_vm2 = vcmask 392192  }
  0x28   :  { %v150_v4 = vpack.c.bf16 %v40_v3, %v39_v2  ;;  %s128_s7 = sshll.u32 %s241_s1, 4  ;;  %s129_s7 = int_to_ptr.vmem [resolvable:$true] %s128_s7 }
  0x29   :  { %s205_s8 = scalar_lea.vmem %s129_s7, 128  ;;  %p210_p3 = scmp.lt.s32.totalorder %s129_s7, %s129_s7 }
  0x2a   :  { %151 = vmatpush3.bf16.msra.mxu0 %v150_v4  ;;  %p206_p2 = scmp.ne.s32.totalorder %s129_s7, %s205_s8  ;;  %p211_p4 = scmp.lt.s32.totalorder %s205_s8, %s205_s8 }
  0x2c   :  { %p212_p5 = por %p211_p4, %p210_p3 }
  0x2d   :  { %147 = vmatmul.mubr.msk.f32.vlgmr.msra.gmra.mrb[0].mxu0 %vm41_vm1, %v38_v5 }
  0x2e   :  { %p213_p6 = pnand %p212_p5, %p206_p2 }
 0x100   :  { %v111_v6 = vpop.f32.mrb[0].mxu0 }
 0x101   :  { %v148_v7 = vpop.f32.mrb[1].mxu0  ;;  %116 = vrot.lane.b32.xlu0 %v111_v6, %s240_s6 }
 0x173   :  { %v117_v8 = vpop.permute.xlu0 %116 }
 0x174   :  { %v119_v9 = vsel %vm41_vm1, %v38_v5, %v117_v8 }
 0x175   :  { %121 = vst.msk [vmem:[#allocation7] sm:$0xff] %vm120_vm2, %v119_v9 }
 0x176   :  { %216 = shalt.err (!%p213_p6)
}
 0x177   :  { %s217_s11 = scalar_lea.hbm %s302_s2, 128 }
 0x178   :  { %p218_p7 = scmp.ne.s32.totalorder %s302_s2, %s217_s11  ;;  %p221_p8 = scmp.lt.u32.totalorder %s217_s11, %s302_s2 }
 0x17a   :  { %p223_p9 = pnand %p221_p8, %p218_p7 }
 0x17c   :  { %226 = shalt.err (!%p223_p9)
}
 0x17d   :  { %131 = dma.vmem_to_hbm [thread:$0]  %s129_s7, 128, %s302_s2, [#allocation4]  }
 0x17e   :  { %231 = dma.done.wait [#allocation4], 128  }
 0x17f   :  { %232 = vsyncadd [#allocation4], 4294967168 }
 0x180   :  { %135 = vsyncpa [#allocation3], 1 }
 0x181   :  { %136 = vsyncpa [#allocation6], 1 }
 0x182   :  { %137 = vsyncpa [#allocation4], 1 }

</bundles_post_ra>
